<compile_context>
chip_gen: v7x
topology: tpu7x:2x2x1
jax: 0.10.0
libtpu: 0.0.40
codegen_flags: <defaults>
</compile_context>

<pallas_src>
import functools
import math

import jax
import jax.numpy as jnp
from jax import lax
from jax.experimental import pallas as pl
from jax.experimental.pallas import tpu as pltpu


def _mha_kernel(x_ref, wqkv_ref, wo_ref, bias_ref, mask_ref, o_ref, *,
                num_heads, head_dim, batch, seq, embed):
    """Multi-head self-attention, whole (tiny) batch in one grid step.

    x_ref   : (B*S, Ep)  lane-padded input rows (bf16)
    wqkv_ref: (Ep, Qp)   fused [Wq|Wk|Wv] weights, lane-padded (bf16)
    wo_ref  : (E, Ep)    output-projection weights, lane-padded (bf16)
    bias_ref: (2, P)     row 0 = fused qkv bias, row 1 = out-proj bias (f32)
    mask_ref: (S, S)     additive mask (f32, blocked = -1e30)
    o_ref   : (B*S, Ep)  lane-padded output rows (f32)
    """
    H, Dh, B, S, E = num_heads, head_dim, batch, seq, embed
    scale = 1.0 / math.sqrt(Dh)
    Qp = wqkv_ref.shape[-1]
    Ep = o_ref.shape[-1]

    b_qkv = bias_ref[0:1, 0:Qp]            # (1, Qp)
    b_out = bias_ref[1:2, 0:Ep]            # (1, Ep)
    add_mask = mask_ref[...]               # (S, S)

    # Fused QKV projection: one lane-dense MXU push for the whole batch.
    qkv = jnp.dot(x_ref[...], wqkv_ref[...],
                  preferred_element_type=jnp.float32) + b_qkv   # (B*S, Qp) f32

    per_batch = []
    for b in range(B):                     # B = 2, static unroll
        qkv_b = qkv[b * S:(b + 1) * S, :]  # (S, Qp) static sublane slice
        heads = []
        for h in range(H):                 # H = 4, static unroll; static lane slices
            qh = qkv_b[:, h * Dh:(h + 1) * Dh]                   # (S, Dh)
            kh = qkv_b[:, E + h * Dh:E + (h + 1) * Dh]           # (S, Dh)
            vh = qkv_b[:, 2 * E + h * Dh:2 * E + (h + 1) * Dh]   # (S, Dh)

            # q·kᵀ by contracting the head dims — no transpose materialized.
            s = lax.dot_general(qh, kh, (((1,), (1,)), ((), ())),
                                preferred_element_type=jnp.float32) * scale
            s = s + add_mask

            # Softmax over keys (f32; EUP reciprocal for the denominator).
            s = s - jnp.max(s, axis=-1, keepdims=True)
            p = jnp.exp(s)
            p = p * pl.reciprocal(jnp.sum(p, axis=-1, keepdims=True), approx=True)

            heads.append(jnp.dot(p, vh, preferred_element_type=jnp.float32))
        per_batch.append(jnp.concatenate(heads, axis=-1))        # (S, E)

    a_all = jnp.concatenate(per_batch, axis=0)                   # (B*S, E)

    # Fused output projection: one MXU push, accumulation inside the MXU.
    out = jnp.dot(a_all.astype(wo_ref.dtype), wo_ref[...],
                  preferred_element_type=jnp.float32) + b_out    # (B*S, Ep)
    o_ref[...] = out.astype(o_ref.dtype)


def attention_block(x, mask, params, *, num_heads=4):
    """x: (B, S, E) float32, mask: (S, S) float32 (0 = blocked)."""
    B, S, E = x.shape
    H = num_heads
    assert E % H == 0, "embed_dim must be divisible by num_heads"
    Dh = E // H
    w_in, b_in, w_out, b_out = params      # (3E,E), (3E,), (E,E), (E,)

    f32, bf16 = jnp.float32, jnp.bfloat16
    w_in = jnp.asarray(w_in, f32)
    b_in = jnp.asarray(b_in, f32)
    w_out = jnp.asarray(w_out, f32)
    b_out = jnp.asarray(b_out, f32)

    def round_up(v, m):
        return ((v + m - 1) // m) * m

    Ep = round_up(E, 128)                  # lane-padded embed width
    Qp = round_up(3 * E, 128)              # lane-padded fused-QKV width
    P = max(Ep, Qp)

    # --- fused, lane-dense weights (PyTorch convention: y = x @ W.T + b) ----
    w_qkv = jnp.pad(w_in.T, ((0, Ep - E), (0, Qp - 3 * E)))      # (Ep, Qp)
    w_o = jnp.pad(w_out.T, ((0, 0), (0, Ep - E)))                # (E, Ep)

    # One stacked bias array: row 0 = qkv bias, row 1 = out-proj bias.
    bias = jnp.stack([jnp.pad(b_in, (0, P - 3 * E)),
                      jnp.pad(b_out, (0, P - E))], axis=0)       # (2, P) f32

    # Lane-pad x, fold batch into rows, cast matmul operands to bf16
    # (accumulation stays f32 inside the kernel).
    x_p = jnp.pad(jnp.asarray(x, f32), ((0, 0), (0, 0), (0, Ep - E)))
    x_p = x_p.reshape(B * S, Ep).astype(bf16)
    w_qkv = w_qkv.astype(bf16)
    w_o = w_o.astype(bf16)

    # --- hoist additive-mask construction out of the kernel -----------------
    # masked_fill(mask == 0, -inf) with a large finite negative (same softmax
    # result, no -inf/NaN edge cases).
    mask_f = jnp.asarray(mask, f32)
    add_mask = jnp.where(mask_f == 0, jnp.float32(-1e30), mask_f)  # (S, S)

    kernel = functools.partial(_mha_kernel, num_heads=H, head_dim=Dh,
                               batch=B, seq=S, embed=E)

    out_p = pl.pallas_call(
        kernel,
        out_shape=jax.ShapeDtypeStruct((B * S, Ep), f32),
        grid=(1,),
        in_specs=[
            pl.BlockSpec((B * S, Ep), lambda i: (0, 0)),   # x (rows)
            pl.BlockSpec((Ep, Qp), lambda i: (0, 0)),      # fused W_qkv
            pl.BlockSpec((E, Ep), lambda i: (0, 0)),       # W_out
            pl.BlockSpec((2, P), lambda i: (0, 0)),        # stacked biases
            pl.BlockSpec((S, S), lambda i: (0, 0)),        # additive mask
        ],
        out_specs=pl.BlockSpec((B * S, Ep), lambda i: (0, 0)),
        compiler_params=pltpu.CompilerParams(
            dimension_semantics=("arbitrary",)),
    )(x_p, w_qkv, w_o, bias, add_mask)

    return out_p[:, :E].reshape(B, S, E)


def init_params(key, embed_dim):
    """Deterministic init of nn.MultiheadAttention-shaped parameters."""
    E = embed_dim
    k1, k2 = jax.random.split(key, 2)
    w_in = jax.random.normal(k1, (3 * E, E), jnp.float32) * 0.02   # in_proj_weight
    b_in = jnp.zeros((3 * E,), jnp.float32)                        # in_proj_bias
    w_out = jax.random.normal(k2, (E, E), jnp.float32) * 0.02      # out_proj.weight
    b_out = jnp.zeros((E,), jnp.float32)                           # out_proj.bias
    return w_in, b_in, w_out, b_out


def _reference_mha(x, mask, params, num_heads):
    """Pure-JAX reference matching the PyTorch module (eval mode)."""
    B, S, E = x.shape
    H = num_heads
    Dh = E // H
    w_in, b_in, w_out, b_out = params
    add_mask = jnp.where(mask == 0, -jnp.inf, mask.astype(jnp.float32))
    qkv = jnp.einsum("bse,fe->bsf", x, w_in) + b_in                 # (B,S,3E)
    q, k, v = jnp.split(qkv, 3, axis=-1)

    def heads(t):  # (B,S,E) -> (B,H,S,Dh)
        return t.reshape(B, S, H, Dh).transpose(0, 2, 1, 3)

    q, k, v = heads(q), heads(k), heads(v)
    s = jnp.einsum("bhqd,bhkd->bhqk", q, k) / math.sqrt(Dh) + add_mask
    p = jax.nn.softmax(s, axis=-1)
    a = jnp.einsum("bhqk,bhkd->bhqd", p, v)
    a = a.transpose(0, 2, 1, 3).reshape(B, S, E)
    return jnp.einsum("bse,fe->bsf", a, w_out) + b_out


if __name__ == "__main__":
    # Small shapes consistent with the module: 4 heads requires E % 4 == 0.
    B, S, E = 2, 8, 32

    key = jax.random.PRNGKey(0)
    kx, kp = jax.random.split(key)

    x = jax.random.normal(kx, (B, S, E), jnp.float32)
    # causal 0/1 mask: 1 = allowed, 0 = blocked (no fully-masked rows)
    mask = jnp.tril(jnp.ones((S, S), jnp.float32))

    params = init_params(kp, E)

    out = attention_block(x, mask, params, num_heads=4)
    out = jax.block_until_ready(out)

    assert out.shape == (B, S, E), out.shape
    assert bool(jnp.all(jnp.isfinite(out)))

    ref = _reference_mha(x, mask, params, num_heads=4)
    assert bool(jnp.allclose(out, ref, rtol=1e-2, atol=2e-3)), (
        float(jnp.max(jnp.abs(out - ref))))

    print("KERNEL_OK")
</pallas_src>

<mosaic_0001>
module attributes {stable_mosaic.version = 11 : i64} {
  func.func @_mha_kernel(%arg0: i32, %arg1: memref<16x128xbf16, #tpu.memory_space<vmem>>, %arg2: memref<128x128xbf16, #tpu.memory_space<vmem>>, %arg3: memref<32x128xbf16, #tpu.memory_space<vmem>>, %arg4: memref<2x128xf32, #tpu.memory_space<vmem>>, %arg5: memref<8x8xf32, #tpu.memory_space<vmem>>, %arg6: memref<16x128xf32, #tpu.memory_space<vmem>>) attributes {dimension_semantics = [#tpu.dimension_semantics<arbitrary>], iteration_bounds = array<i64: 1>, scalar_prefetch = 0 : i64, scratch_operands = 0 : i64, tpu.core_type = #tpu.core_type<tc>, window_params = [{pipeline_mode = #tpu.pipeline_mode<synchronous>, transform_indices = @transform_0, window_bounds = array<i64: 16, 128>}, {pipeline_mode = #tpu.pipeline_mode<synchronous>, transform_indices = @transform_1, window_bounds = array<i64: 128, 128>}, {pipeline_mode = #tpu.pipeline_mode<synchronous>, transform_indices = @transform_2, window_bounds = array<i64: 32, 128>}, {pipeline_mode = #tpu.pipeline_mode<synchronous>, transform_indices = @transform_3, window_bounds = array<i64: 2, 128>}, {pipeline_mode = #tpu.pipeline_mode<synchronous>, transform_indices = @transform_4, window_bounds = array<i64: 8, 8>}, {pipeline_mode = #tpu.pipeline_mode<synchronous>, transform_indices = @transform_5, window_bounds = array<i64: 16, 128>}]} {
    %c0 = arith.constant 0 : index
    %c0_0 = arith.constant 0 : index
    %0 = vector.load %arg4[%c0, %c0_0] : memref<2x128xf32, #tpu.memory_space<vmem>>, vector<1x128xf32>
    %c1 = arith.constant 1 : index
    %c0_1 = arith.constant 0 : index
    %1 = vector.load %arg4[%c1, %c0_1] : memref<2x128xf32, #tpu.memory_space<vmem>>, vector<1x128xf32>
    %c0_2 = arith.constant 0 : index
    %c0_3 = arith.constant 0 : index
    %2 = vector.load %arg5[%c0_2, %c0_3] : memref<8x8xf32, #tpu.memory_space<vmem>>, vector<8x8xf32>
    %c0_4 = arith.constant 0 : index
    %c0_5 = arith.constant 0 : index
    %3 = vector.load %arg1[%c0_4, %c0_5] : memref<16x128xbf16, #tpu.memory_space<vmem>>, vector<16x128xbf16>
    %c0_6 = arith.constant 0 : index
    %c0_7 = arith.constant 0 : index
    %4 = vector.load %arg2[%c0_6, %c0_7] : memref<128x128xbf16, #tpu.memory_space<vmem>>, vector<128x128xbf16>
    %cst = arith.constant dense<0.000000e+00> : vector<16x128xf32>
    %5 = tpu.matmul %3, %4, %cst {dimension_numbers = #tpu.dot_dimension_numbers<[1], [0], [0], [1], [0, 0, 1, 1], [], []>} : vector<16x128xbf16>, vector<128x128xbf16>, vector<16x128xf32> -> vector<16x128xf32>
    %6 = vector.broadcast %0 : vector<1x128xf32> to vector<16x128xf32>
    %7 = arith.addf %5, %6 : vector<16x128xf32>
    %8 = vector.extract_strided_slice %7 {offsets = [0, 0], sizes = [8, 128], strides = [1, 1]} : vector<16x128xf32> to vector<8x128xf32>
    %9 = vector.extract_strided_slice %8 {offsets = [0, 0], sizes = [8, 8], strides = [1, 1]} : vector<8x128xf32> to vector<8x8xf32>
    %10 = vector.extract_strided_slice %8 {offsets = [0, 32], sizes = [8, 8], strides = [1, 1]} : vector<8x128xf32> to vector<8x8xf32>
    %11 = vector.extract_strided_slice %8 {offsets = [0, 64], sizes = [8, 8], strides = [1, 1]} : vector<8x128xf32> to vector<8x8xf32>
    %cst_8 = arith.constant dense<0.000000e+00> : vector<8x8xf32>
    %12 = tpu.matmul %9, %10, %cst_8 {dimension_numbers = #tpu.dot_dimension_numbers<[1], [1], [0], [0], [0, 0, 1, 0], [], []>} : vector<8x8xf32>, vector<8x8xf32>, vector<8x8xf32> -> vector<8x8xf32>
    %cst_9 = arith.constant 0.353553385 : f32
    %13 = vector.broadcast %cst_9 : f32 to vector<8x8xf32>
    %14 = arith.mulf %12, %13 : vector<8x8xf32>
    %15 = arith.addf %14, %2 : vector<8x8xf32>
    %cst_10 = arith.constant dense<0xFF800000> : vector<8xf32>
    %16 = vector.multi_reduction <maximumf>, %15, %cst_10 [1] : vector<8x8xf32> to vector<8xf32>
    %17 = vector.shape_cast %16 : vector<8xf32> to vector<8x1xf32>
    %18 = vector.broadcast %17 : vector<8x1xf32> to vector<8x8xf32>
    %19 = arith.subf %15, %18 : vector<8x8xf32>
    %20 = math.exp %19 : vector<8x8xf32>
    %cst_11 = arith.constant dense<0.000000e+00> : vector<8xf32>
    %21 = vector.multi_reduction <add>, %20, %cst_11 [1] : vector<8x8xf32> to vector<8xf32>
    %22 = vector.shape_cast %21 : vector<8xf32> to vector<8x1xf32>
    %23 = tpu.reciprocal %22 {approx = true} : vector<8x1xf32> -> vector<8x1xf32>
    %24 = vector.broadcast %23 : vector<8x1xf32> to vector<8x8xf32>
    %25 = arith.mulf %20, %24 : vector<8x8xf32>
    %cst_12 = arith.constant dense<0.000000e+00> : vector<8x8xf32>
    %26 = tpu.matmul %25, %11, %cst_12 {dimension_numbers = #tpu.dot_dimension_numbers<[1], [0], [0], [1], [0, 0, 1, 1], [], []>} : vector<8x8xf32>, vector<8x8xf32>, vector<8x8xf32> -> vector<8x8xf32>
    %27 = vector.extract_strided_slice %8 {offsets = [0, 8], sizes = [8, 8], strides = [1, 1]} : vector<8x128xf32> to vector<8x8xf32>
    %28 = vector.extract_strided_slice %8 {offsets = [0, 40], sizes = [8, 8], strides = [1, 1]} : vector<8x128xf32> to vector<8x8xf32>
    %29 = vector.extract_strided_slice %8 {offsets = [0, 72], sizes = [8, 8], strides = [1, 1]} : vector<8x128xf32> to vector<8x8xf32>
    %cst_13 = arith.constant dense<0.000000e+00> : vector<8x8xf32>
    %30 = tpu.matmul %27, %28, %cst_13 {dimension_numbers = #tpu.dot_dimension_numbers<[1], [1], [0], [0], [0, 0, 1, 0], [], []>} : vector<8x8xf32>, vector<8x8xf32>, vector<8x8xf32> -> vector<8x8xf32>
    %cst_14 = arith.constant 0.353553385 : f32
    %31 = vector.broadcast %cst_14 : f32 to vector<8x8xf32>
    %32 = arith.mulf %30, %31 : vector<8x8xf32>
    %33 = arith.addf %32, %2 : vector<8x8xf32>
    %cst_15 = arith.constant dense<0xFF800000> : vector<8xf32>
    %34 = vector.multi_reduction <maximumf>, %33, %cst_15 [1] : vector<8x8xf32> to vector<8xf32>
    %35 = vector.shape_cast %34 : vector<8xf32> to vector<8x1xf32>
    %36 = vector.broadcast %35 : vector<8x1xf32> to vector<8x8xf32>
    %37 = arith.subf %33, %36 : vector<8x8xf32>
    %38 = math.exp %37 : vector<8x8xf32>
    %cst_16 = arith.constant dense<0.000000e+00> : vector<8xf32>
    %39 = vector.multi_reduction <add>, %38, %cst_16 [1] : vector<8x8xf32> to vector<8xf32>
    %40 = vector.shape_cast %39 : vector<8xf32> to vector<8x1xf32>
    %41 = tpu.reciprocal %40 {approx = true} : vector<8x1xf32> -> vector<8x1xf32>
    %42 = vector.broadcast %41 : vector<8x1xf32> to vector<8x8xf32>
    %43 = arith.mulf %38, %42 : vector<8x8xf32>
    %cst_17 = arith.constant dense<0.000000e+00> : vector<8x8xf32>
    %44 = tpu.matmul %43, %29, %cst_17 {dimension_numbers = #tpu.dot_dimension_numbers<[1], [0], [0], [1], [0, 0, 1, 1], [], []>} : vector<8x8xf32>, vector<8x8xf32>, vector<8x8xf32> -> vector<8x8xf32>
    %45 = vector.extract_strided_slice %8 {offsets = [0, 16], sizes = [8, 8], strides = [1, 1]} : vector<8x128xf32> to vector<8x8xf32>
    %46 = vector.extract_strided_slice %8 {offsets = [0, 48], sizes = [8, 8], strides = [1, 1]} : vector<8x128xf32> to vector<8x8xf32>
    %47 = vector.extract_strided_slice %8 {offsets = [0, 80], sizes = [8, 8], strides = [1, 1]} : vector<8x128xf32> to vector<8x8xf32>
    %cst_18 = arith.constant dense<0.000000e+00> : vector<8x8xf32>
    %48 = tpu.matmul %45, %46, %cst_18 {dimension_numbers = #tpu.dot_dimension_numbers<[1], [1], [0], [0], [0, 0, 1, 0], [], []>} : vector<8x8xf32>, vector<8x8xf32>, vector<8x8xf32> -> vector<8x8xf32>
    %cst_19 = arith.constant 0.353553385 : f32
    %49 = vector.broadcast %cst_19 : f32 to vector<8x8xf32>
    %50 = arith.mulf %48, %49 : vector<8x8xf32>
    %51 = arith.addf %50, %2 : vector<8x8xf32>
    %cst_20 = arith.constant dense<0xFF800000> : vector<8xf32>
    %52 = vector.multi_reduction <maximumf>, %51, %cst_20 [1] : vector<8x8xf32> to vector<8xf32>
    %53 = vector.shape_cast %52 : vector<8xf32> to vector<8x1xf32>
    %54 = vector.broadcast %53 : vector<8x1xf32> to vector<8x8xf32>
    %55 = arith.subf %51, %54 : vector<8x8xf32>
    %56 = math.exp %55 : vector<8x8xf32>
    %cst_21 = arith.constant dense<0.000000e+00> : vector<8xf32>
    %57 = vector.multi_reduction <add>, %56, %cst_21 [1] : vector<8x8xf32> to vector<8xf32>
    %58 = vector.shape_cast %57 : vector<8xf32> to vector<8x1xf32>
    %59 = tpu.reciprocal %58 {approx = true} : vector<8x1xf32> -> vector<8x1xf32>
    %60 = vector.broadcast %59 : vector<8x1xf32> to vector<8x8xf32>
    %61 = arith.mulf %56, %60 : vector<8x8xf32>
    %cst_22 = arith.constant dense<0.000000e+00> : vector<8x8xf32>
    %62 = tpu.matmul %61, %47, %cst_22 {dimension_numbers = #tpu.dot_dimension_numbers<[1], [0], [0], [1], [0, 0, 1, 1], [], []>} : vector<8x8xf32>, vector<8x8xf32>, vector<8x8xf32> -> vector<8x8xf32>
    %63 = vector.extract_strided_slice %8 {offsets = [0, 24], sizes = [8, 8], strides = [1, 1]} : vector<8x128xf32> to vector<8x8xf32>
    %64 = vector.extract_strided_slice %8 {offsets = [0, 56], sizes = [8, 8], strides = [1, 1]} : vector<8x128xf32> to vector<8x8xf32>
    %65 = vector.extract_strided_slice %8 {offsets = [0, 88], sizes = [8, 8], strides = [1, 1]} : vector<8x128xf32> to vector<8x8xf32>
    %cst_23 = arith.constant dense<0.000000e+00> : vector<8x8xf32>
    %66 = tpu.matmul %63, %64, %cst_23 {dimension_numbers = #tpu.dot_dimension_numbers<[1], [1], [0], [0], [0, 0, 1, 0], [], []>} : vector<8x8xf32>, vector<8x8xf32>, vector<8x8xf32> -> vector<8x8xf32>
    %cst_24 = arith.constant 0.353553385 : f32
    %67 = vector.broadcast %cst_24 : f32 to vector<8x8xf32>
    %68 = arith.mulf %66, %67 : vector<8x8xf32>
    %69 = arith.addf %68, %2 : vector<8x8xf32>
    %cst_25 = arith.constant dense<0xFF800000> : vector<8xf32>
    %70 = vector.multi_reduction <maximumf>, %69, %cst_25 [1] : vector<8x8xf32> to vector<8xf32>
    %71 = vector.shape_cast %70 : vector<8xf32> to vector<8x1xf32>
    %72 = vector.broadcast %71 : vector<8x1xf32> to vector<8x8xf32>
    %73 = arith.subf %69, %72 : vector<8x8xf32>
    %74 = math.exp %73 : vector<8x8xf32>
    %cst_26 = arith.constant dense<0.000000e+00> : vector<8xf32>
    %75 = vector.multi_reduction <add>, %74, %cst_26 [1] : vector<8x8xf32> to vector<8xf32>
    %76 = vector.shape_cast %75 : vector<8xf32> to vector<8x1xf32>
    %77 = tpu.reciprocal %76 {approx = true} : vector<8x1xf32> -> vector<8x1xf32>
    %78 = vector.broadcast %77 : vector<8x1xf32> to vector<8x8xf32>
    %79 = arith.mulf %74, %78 : vector<8x8xf32>
    %cst_27 = arith.constant dense<0.000000e+00> : vector<8x8xf32>
    %80 = tpu.matmul %79, %65, %cst_27 {dimension_numbers = #tpu.dot_dimension_numbers<[1], [0], [0], [1], [0, 0, 1, 1], [], []>} : vector<8x8xf32>, vector<8x8xf32>, vector<8x8xf32> -> vector<8x8xf32>
    %81 = tpu.concatenate %26, %44, %62, %80 in 1 : vector<8x8xf32>, vector<8x8xf32>, vector<8x8xf32>, vector<8x8xf32> -> vector<8x32xf32>
    %82 = vector.extract_strided_slice %7 {offsets = [8, 0], sizes = [8, 128], strides = [1, 1]} : vector<16x128xf32> to vector<8x128xf32>
    %83 = vector.extract_strided_slice %82 {offsets = [0, 0], sizes = [8, 8], strides = [1, 1]} : vector<8x128xf32> to vector<8x8xf32>
    %84 = vector.extract_strided_slice %82 {offsets = [0, 32], sizes = [8, 8], strides = [1, 1]} : vector<8x128xf32> to vector<8x8xf32>
    %85 = vector.extract_strided_slice %82 {offsets = [0, 64], sizes = [8, 8], strides = [1, 1]} : vector<8x128xf32> to vector<8x8xf32>
    %cst_28 = arith.constant dense<0.000000e+00> : vector<8x8xf32>
    %86 = tpu.matmul %83, %84, %cst_28 {dimension_numbers = #tpu.dot_dimension_numbers<[1], [1], [0], [0], [0, 0, 1, 0], [], []>} : vector<8x8xf32>, vector<8x8xf32>, vector<8x8xf32> -> vector<8x8xf32>
    %cst_29 = arith.constant 0.353553385 : f32
    %87 = vector.broadcast %cst_29 : f32 to vector<8x8xf32>
    %88 = arith.mulf %86, %87 : vector<8x8xf32>
    %89 = arith.addf %88, %2 : vector<8x8xf32>
    %cst_30 = arith.constant dense<0xFF800000> : vector<8xf32>
    %90 = vector.multi_reduction <maximumf>, %89, %cst_30 [1] : vector<8x8xf32> to vector<8xf32>
    %91 = vector.shape_cast %90 : vector<8xf32> to vector<8x1xf32>
    %92 = vector.broadcast %91 : vector<8x1xf32> to vector<8x8xf32>
    %93 = arith.subf %89, %92 : vector<8x8xf32>
    %94 = math.exp %93 : vector<8x8xf32>
    %cst_31 = arith.constant dense<0.000000e+00> : vector<8xf32>
    %95 = vector.multi_reduction <add>, %94, %cst_31 [1] : vector<8x8xf32> to vector<8xf32>
    %96 = vector.shape_cast %95 : vector<8xf32> to vector<8x1xf32>
    %97 = tpu.reciprocal %96 {approx = true} : vector<8x1xf32> -> vector<8x1xf32>
    %98 = vector.broadcast %97 : vector<8x1xf32> to vector<8x8xf32>
    %99 = arith.mulf %94, %98 : vector<8x8xf32>
    %cst_32 = arith.constant dense<0.000000e+00> : vector<8x8xf32>
    %100 = tpu.matmul %99, %85, %cst_32 {dimension_numbers = #tpu.dot_dimension_numbers<[1], [0], [0], [1], [0, 0, 1, 1], [], []>} : vector<8x8xf32>, vector<8x8xf32>, vector<8x8xf32> -> vector<8x8xf32>
    %101 = vector.extract_strided_slice %82 {offsets = [0, 8], sizes = [8, 8], strides = [1, 1]} : vector<8x128xf32> to vector<8x8xf32>
    %102 = vector.extract_strided_slice %82 {offsets = [0, 40], sizes = [8, 8], strides = [1, 1]} : vector<8x128xf32> to vector<8x8xf32>
    %103 = vector.extract_strided_slice %82 {offsets = [0, 72], sizes = [8, 8], strides = [1, 1]} : vector<8x128xf32> to vector<8x8xf32>
    %cst_33 = arith.constant dense<0.000000e+00> : vector<8x8xf32>
    %104 = tpu.matmul %101, %102, %cst_33 {dimension_numbers = #tpu.dot_dimension_numbers<[1], [1], [0], [0], [0, 0, 1, 0], [], []>} : vector<8x8xf32>, vector<8x8xf32>, vector<8x8xf32> -> vector<8x8xf32>
    %cst_34 = arith.constant 0.353553385 : f32
    %105 = vector.broadcast %cst_34 : f32 to vector<8x8xf32>
    %106 = arith.mulf %104, %105 : vector<8x8xf32>
    %107 = arith.addf %106, %2 : vector<8x8xf32>
    %cst_35 = arith.constant dense<0xFF800000> : vector<8xf32>
    %108 = vector.multi_reduction <maximumf>, %107, %cst_35 [1] : vector<8x8xf32> to vector<8xf32>
    %109 = vector.shape_cast %108 : vector<8xf32> to vector<8x1xf32>
    %110 = vector.broadcast %109 : vector<8x1xf32> to vector<8x8xf32>
    %111 = arith.subf %107, %110 : vector<8x8xf32>
    %112 = math.exp %111 : vector<8x8xf32>
    %cst_36 = arith.constant dense<0.000000e+00> : vector<8xf32>
    %113 = vector.multi_reduction <add>, %112, %cst_36 [1] : vector<8x8xf32> to vector<8xf32>
    %114 = vector.shape_cast %113 : vector<8xf32> to vector<8x1xf32>
    %115 = tpu.reciprocal %114 {approx = true} : vector<8x1xf32> -> vector<8x1xf32>
    %116 = vector.broadcast %115 : vector<8x1xf32> to vector<8x8xf32>
    %117 = arith.mulf %112, %116 : vector<8x8xf32>
    %cst_37 = arith.constant dense<0.000000e+00> : vector<8x8xf32>
    %118 = tpu.matmul %117, %103, %cst_37 {dimension_numbers = #tpu.dot_dimension_numbers<[1], [0], [0], [1], [0, 0, 1, 1], [], []>} : vector<8x8xf32>, vector<8x8xf32>, vector<8x8xf32> -> vector<8x8xf32>
    %119 = vector.extract_strided_slice %82 {offsets = [0, 16], sizes = [8, 8], strides = [1, 1]} : vector<8x128xf32> to vector<8x8xf32>
    %120 = vector.extract_strided_slice %82 {offsets = [0, 48], sizes = [8, 8], strides = [1, 1]} : vector<8x128xf32> to vector<8x8xf32>
    %121 = vector.extract_strided_slice %82 {offsets = [0, 80], sizes = [8, 8], strides = [1, 1]} : vector<8x128xf32> to vector<8x8xf32>
    %cst_38 = arith.constant dense<0.000000e+00> : vector<8x8xf32>
    %122 = tpu.matmul %119, %120, %cst_38 {dimension_numbers = #tpu.dot_dimension_numbers<[1], [1], [0], [0], [0, 0, 1, 0], [], []>} : vector<8x8xf32>, vector<8x8xf32>, vector<8x8xf32> -> vector<8x8xf32>
    %cst_39 = arith.constant 0.353553385 : f32
    %123 = vector.broadcast %cst_39 : f32 to vector<8x8xf32>
    %124 = arith.mulf %122, %123 : vector<8x8xf32>
    %125 = arith.addf %124, %2 : vector<8x8xf32>
    %cst_40 = arith.constant dense<0xFF800000> : vector<8xf32>
    %126 = vector.multi_reduction <maximumf>, %125, %cst_40 [1] : vector<8x8xf32> to vector<8xf32>
    %127 = vector.shape_cast %126 : vector<8xf32> to vector<8x1xf32>
    %128 = vector.broadcast %127 : vector<8x1xf32> to vector<8x8xf32>
    %129 = arith.subf %125, %128 : vector<8x8xf32>
    %130 = math.exp %129 : vector<8x8xf32>
    %cst_41 = arith.constant dense<0.000000e+00> : vector<8xf32>
    %131 = vector.multi_reduction <add>, %130, %cst_41 [1] : vector<8x8xf32> to vector<8xf32>
    %132 = vector.shape_cast %131 : vector<8xf32> to vector<8x1xf32>
    %133 = tpu.reciprocal %132 {approx = true} : vector<8x1xf32> -> vector<8x1xf32>
    %134 = vector.broadcast %133 : vector<8x1xf32> to vector<8x8xf32>
    %135 = arith.mulf %130, %134 : vector<8x8xf32>
    %cst_42 = arith.constant dense<0.000000e+00> : vector<8x8xf32>
    %136 = tpu.matmul %135, %121, %cst_42 {dimension_numbers = #tpu.dot_dimension_numbers<[1], [0], [0], [1], [0, 0, 1, 1], [], []>} : vector<8x8xf32>, vector<8x8xf32>, vector<8x8xf32> -> vector<8x8xf32>
    %137 = vector.extract_strided_slice %82 {offsets = [0, 24], sizes = [8, 8], strides = [1, 1]} : vector<8x128xf32> to vector<8x8xf32>
    %138 = vector.extract_strided_slice %82 {offsets = [0, 56], sizes = [8, 8], strides = [1, 1]} : vector<8x128xf32> to vector<8x8xf32>
    %139 = vector.extract_strided_slice %82 {offsets = [0, 88], sizes = [8, 8], strides = [1, 1]} : vector<8x128xf32> to vector<8x8xf32>
    %cst_43 = arith.constant dense<0.000000e+00> : vector<8x8xf32>
    %140 = tpu.matmul %137, %138, %cst_43 {dimension_numbers = #tpu.dot_dimension_numbers<[1], [1], [0], [0], [0, 0, 1, 0], [], []>} : vector<8x8xf32>, vector<8x8xf32>, vector<8x8xf32> -> vector<8x8xf32>
    %cst_44 = arith.constant 0.353553385 : f32
    %141 = vector.broadcast %cst_44 : f32 to vector<8x8xf32>
    %142 = arith.mulf %140, %141 : vector<8x8xf32>
    %143 = arith.addf %142, %2 : vector<8x8xf32>
    %cst_45 = arith.constant dense<0xFF800000> : vector<8xf32>
    %144 = vector.multi_reduction <maximumf>, %143, %cst_45 [1] : vector<8x8xf32> to vector<8xf32>
    %145 = vector.shape_cast %144 : vector<8xf32> to vector<8x1xf32>
    %146 = vector.broadcast %145 : vector<8x1xf32> to vector<8x8xf32>
    %147 = arith.subf %143, %146 : vector<8x8xf32>
    %148 = math.exp %147 : vector<8x8xf32>
    %cst_46 = arith.constant dense<0.000000e+00> : vector<8xf32>
    %149 = vector.multi_reduction <add>, %148, %cst_46 [1] : vector<8x8xf32> to vector<8xf32>
    %150 = vector.shape_cast %149 : vector<8xf32> to vector<8x1xf32>
    %151 = tpu.reciprocal %150 {approx = true} : vector<8x1xf32> -> vector<8x1xf32>
    %152 = vector.broadcast %151 : vector<8x1xf32> to vector<8x8xf32>
    %153 = arith.mulf %148, %152 : vector<8x8xf32>
    %cst_47 = arith.constant dense<0.000000e+00> : vector<8x8xf32>
    %154 = tpu.matmul %153, %139, %cst_47 {dimension_numbers = #tpu.dot_dimension_numbers<[1], [0], [0], [1], [0, 0, 1, 1], [], []>} : vector<8x8xf32>, vector<8x8xf32>, vector<8x8xf32> -> vector<8x8xf32>
    %155 = tpu.concatenate %100, %118, %136, %154 in 1 : vector<8x8xf32>, vector<8x8xf32>, vector<8x8xf32>, vector<8x8xf32> -> vector<8x32xf32>
    %156 = tpu.concatenate %81, %155 in 0 : vector<8x32xf32>, vector<8x32xf32> -> vector<16x32xf32>
    %157 = arith.truncf %156 : vector<16x32xf32> to vector<16x32xbf16>
    %c0_48 = arith.constant 0 : index
    %c0_49 = arith.constant 0 : index
    %158 = vector.load %arg3[%c0_48, %c0_49] : memref<32x128xbf16, #tpu.memory_space<vmem>>, vector<32x128xbf16>
    %cst_50 = arith.constant dense<0.000000e+00> : vector<16x128xf32>
    %159 = tpu.matmul %157, %158, %cst_50 {dimension_numbers = #tpu.dot_dimension_numbers<[1], [0], [0], [1], [0, 0, 1, 1], [], []>} : vector<16x32xbf16>, vector<32x128xbf16>, vector<16x128xf32> -> vector<16x128xf32>
    %160 = vector.broadcast %1 : vector<1x128xf32> to vector<16x128xf32>
    %161 = arith.addf %159, %160 : vector<16x128xf32>
    %c0_51 = arith.constant 0 : index
    %c0_52 = arith.constant 0 : index
    %162 = vector.load %arg6[%c0_51, %c0_52] : memref<16x128xf32, #tpu.memory_space<vmem>>, vector<16x128xf32>
    tpu.vector_store %arg6[%c0_51, %c0_52], %161 {strides = array<i32>} : memref<16x128xf32, #tpu.memory_space<vmem>>, vector<16x128xf32>,
    return
  }
  func.func @transform_0(%arg0: i32) -> (i32, i32) {
    %c0_i32 = arith.constant 0 : i32
    %c0_i32_0 = arith.constant 0 : i32
    %c0_i32_1 = arith.constant 0 : i32
    return %c0_i32, %c0_i32_0 : i32, i32
  }
  func.func @transform_1(%arg0: i32) -> (i32, i32) {
    %c0_i32 = arith.constant 0 : i32
    %c0_i32_0 = arith.constant 0 : i32
    %c0_i32_1 = arith.constant 0 : i32
    return %c0_i32, %c0_i32_0 : i32, i32
  }
  func.func @transform_2(%arg0: i32) -> (i32, i32) {
    %c0_i32 = arith.constant 0 : i32
    %c0_i32_0 = arith.constant 0 : i32
    %c0_i32_1 = arith.constant 0 : i32
    return %c0_i32, %c0_i32_0 : i32, i32
  }
  func.func @transform_3(%arg0: i32) -> (i32, i32) {
    %c0_i32 = arith.constant 0 : i32
    %c0_i32_0 = arith.constant 0 : i32
    %c0_i32_1 = arith.constant 0 : i32
    return %c0_i32, %c0_i32_0 : i32, i32
  }
  func.func @transform_4(%arg0: i32) -> (i32, i32) {
    %c0_i32 = arith.constant 0 : i32
    %c0_i32_0 = arith.constant 0 : i32
    %c0_i32_1 = arith.constant 0 : i32
    return %c0_i32, %c0_i32_0 : i32, i32
  }
  func.func @transform_5(%arg0: i32) -> (i32, i32) {
    %c0_i32 = arith.constant 0 : i32
    %c0_i32_0 = arith.constant 0 : i32
    %c0_i32_1 = arith.constant 0 : i32
    return %c0_i32, %c0_i32_0 : i32, i32
  }
}

</mosaic_0001>

<bundles_post_ra>
// kernel: tpu_custom_call.1
= control target key start
LH: loop header
LB: loop body
LE: loop exit
PB: predicated region body
PF: predicated region fallthrough
CT: control target
= control target key end

     0   :  { %10 = vsyncpa [#allocation3], 0  ;;  %s2303_s0 = inlined_call_operand.hbm [shape: bf16[16,128], index: 0, kind: input, shape index: {}]   ;;  %s2304_s1 = inlined_call_operand.hbm [shape: bf16[128,128], index: 1, kind: input, shape index: {}]   ;;  %s2305_s2 = inlined_call_operand.hbm [shape: bf16[32,128], index: 2, kind: input, shape index: {}]   ;;  %s2306_s3 = inlined_call_operand.vmem [shape: f32[2,128], index: 3, kind: input, shape index: {}]   ;;  %s2307_s4 = inlined_call_operand.vmem [shape: f32[8,8], index: 4, kind: input, shape index: {}]   ;;  %s2308_s5 = inlined_call_operand.hbm [shape: f32[16,128], index: 5, kind: output, shape index: {}]  }
   0x1   :  { %11 = vsyncpa [#allocation6], 0 }
   0x2   :  { %12 = vsyncpa [#allocation4], 0  ;;  %s2000_s18 = smov [#allocation5]   ;;  %s2001_s20 = smov [#allocation2]  }
   0x3   :  { %s30_s19 = sshll.u32 %s2000_s18, 4  ;;  %s18_s21 = sshll.u32 %s2001_s20, 4  ;;  %s31_s19 = int_to_ptr.vmem [resolvable:$true] %s30_s19  ;;  %s2052_s21 = int_to_ptr.vmem [resolvable:$true] %s18_s21 }
   0x4   :  { %s1906_s24 = scalar_lea.hbm %s2304_s1, 1024 }
   0x5   :  { %p1907_p0 = scmp.ne.s32.totalorder %s2304_s1, %s1906_s24  ;;  %p1910_p1 = scmp.lt.u32.totalorder %s1906_s24, %s2304_s1 }
   0x7   :  { %p1912_p2 = pnand %p1910_p1, %p1907_p0 }
   0x9   :  { %1915 = shalt.err (!%p1912_p2)
}
   0xa   :  { %s1916_s29 = scalar_lea.vmem %s31_s19, 1024  ;;  %p1921_p4 = scmp.lt.s32.totalorder %s31_s19, %s31_s19 }
   0xb   :  { %p1917_p3 = scmp.ne.s32.totalorder %s31_s19, %s1916_s29  ;;  %p1922_p5 = scmp.lt.s32.totalorder %s1916_s29, %s1916_s29 }
   0xd   :  { %p1923_p6 = por %p1922_p5, %p1921_p4 }
   0xf   :  { %p1924_p7 = pnand %p1923_p6, %p1917_p3 }
  0x11   :  { %1927 = shalt.err (!%p1924_p7)
}
  0x12   :  { %s2002_s30 = smov 64   ;;  %s2003_s6 = smov 4  }
  0x13   :  { %36 = dma.hbm_to_vmem [thread:$0]  %s2304_s1, 1024, %s31_s19, [#allocation6], %s2002_s30, %s2002_s30, %s2003_s6  }
  0x14   :  { %s1928_s11 = scalar_lea.hbm %s2303_s0, 128 }
  0x15   :  { %p1929_p8 = scmp.ne.s32.totalorder %s2303_s0, %s1928_s11  ;;  %p1932_p9 = scmp.lt.u32.totalorder %s1928_s11, %s2303_s0 }
  0x17   :  { %p1934_p10 = pnand %p1932_p9, %p1929_p8 }
  0x19   :  { %1937 = shalt.err (!%p1934_p10)
}
  0x1a   :  { %s1938_s16 = scalar_lea.vmem %s2052_s21, 128  ;;  %p1943_p12 = scmp.lt.s32.totalorder %s2052_s21, %s2052_s21 }
  0x1b   :  { %p1939_p11 = scmp.ne.s32.totalorder %s2052_s21, %s1938_s16  ;;  %p1944_p13 = scmp.lt.s32.totalorder %s1938_s16, %s1938_s16 }
  0x1d   :  { %p1945_p0 = por %p1944_p13, %p1943_p12 }
  0x1f   :  { %p1946_p1 = pnand %p1945_p0, %p1939_p11 }
  0x21   :  { %1949 = shalt.err (!%p1946_p1)
}
  0x22   :  { %24 = dma.hbm_to_vmem [thread:$0]  %s2303_s0, 128, %s2052_s21, [#allocation3], %s2002_s30, %s2002_s30, %s2003_s6  }
  0x23   :  { %s2004_s18 = smov [#allocation7]   ;;  %s1950_s23 = scalar_lea.hbm %s2305_s2, 256 }
  0x24   :  { %s42_s19 = sshll.u32 %s2004_s18, 4  ;;  %p1951_p2 = scmp.ne.s32.totalorder %s2305_s2, %s1950_s23  ;;  %s43_s19 = int_to_ptr.vmem [resolvable:$true] %s42_s19 }
  0x25   :  { %p1954_p3 = scmp.lt.u32.totalorder %s1950_s23, %s2305_s2 }
  0x27   :  { %p1956_p4 = pnand %p1954_p3, %p1951_p2 }
  0x29   :  { %1959 = shalt.err (!%p1956_p4)
}
  0x2a   :  { %s1960_s28 = scalar_lea.vmem %s43_s19, 256  ;;  %p1965_p6 = scmp.lt.s32.totalorder %s43_s19, %s43_s19 }
  0x2b   :  { %p1961_p5 = scmp.ne.s32.totalorder %s43_s19, %s1960_s28  ;;  %p1966_p7 = scmp.lt.s32.totalorder %s1960_s28, %s1960_s28 }
  0x2d   :  { %p1967_p8 = por %p1966_p7, %p1965_p6 }
  0x2f   :  { %p1968_p9 = pnand %p1967_p8, %p1961_p5 }
  0x31   :  { %1971 = shalt.err (!%p1968_p9)
}
  0x32   :  { %48 = dma.hbm_to_vmem [thread:$0]  %s2305_s2, 256, %s43_s19, [#allocation6], %s2002_s30, %s2002_s30, %s2003_s6  }
  0x33   :  { %1994 = dma.done.wait [#allocation3], 128  }
  0x34   :  { %1995 = vsyncadd [#allocation3], 4294967168 }
  0x35   :  { %1996 = dma.done.wait [#allocation6], 1280  }
  0x36   :  { %1997 = vsyncadd [#allocation6], 4294966016  ;;  %v2005_v0 = vmov 0.0   ;;  %vm2006_vm0 = vmmov 0   ;;  %v1863_v1 = vld [vmem:[#allocation5] sm:$0xff]   ;;  %v1864_v2 = vld [vmem:[#allocation5 + $0x8] sm:$0xff]  }
  0x37   :  { %1718 = vmatprep.subr.bf16.mxu0 %v2005_v0  ;;  %1734 = vmatprep.mubr.msk.bf16.mxu0 %vm2006_vm0, %v2005_v0  ;;  %v1865_v3 = vld [vmem:[#allocation5 + $0x10] sm:$0xff]   ;;  %v1866_v4 = vld [vmem:[#allocation5 + $0x18] sm:$0xff]   ;;  %v1867_v5 = vld [vmem:[#allocation5 + $0x20] sm:$0xff]   ;;  %s2007_s6 = smov 96   ;;  %s2008_s7 = smov 88   ;;  %vm186_vm1 = vcmask 64512  }
  0x38   :  { %1743 = vmatprep.subr.mxu1 %v2005_v0  ;;  %1745 = vmatprep.mubr.msk.f32.mxu1 %vm2006_vm0, %v2005_v0  ;;  %v1868_v6 = vld [vmem:[#allocation5 + $0x28] sm:$0xff]   ;;  %v1869_v7 = vld [vmem:[#allocation5 + $0x30] sm:$0xff]   ;;  %v1870_v8 = vld [vmem:[#allocation5 + $0x38] sm:$0xff]   ;;  %s2009_s10 = smov 56   ;;  %s2010_s11 = smov 80   ;;  %vm864_vm2 = vcmask 130048  }
  0x39   :  { %1719 = vmatpush3.bf16.msra.mxu0 %v1863_v1  ;;  %v1871_v9 = vld [vmem:[#allocation2] sm:$0xff]   ;;  %s2012_s12 = smov 112   ;;  %s2013_s13 = smov 48   ;;  %vm866_vm3 = vcmask 195584   ;;  %vm1571_vm4 = vcmask 261120  }
  0x3a   :  { %1720 = vmatprep.subr.bf16.mxu0 %v2005_v0  ;;  %v1636_v10 = vld [vmem:[%s2306_s3] ss:$0 sm:$0xff]  ;;  %s2014_s14 = smov 72   ;;  %s2015_s15 = smov 104  }
  0x3b   :  { %v2143_v20 = vld [vmem:[%s2307_s4] sm:$0xff]  ;;  %s2011_s4 = smov 120   ;;  %s2016_s16 = smov 40  }
  0x3c   :  { %s2018_s1 = smov 16   ;;  %s2019_s17 = smov 24  }
  0x3d   :  { %1721 = vmatpush3.bf16.msra.mxu0 %v1864_v2  ;;  %s2020_s20 = smov [#allocation8]  }
  0x3e   :  { %1722 = vmatprep.subr.bf16.mxu0 %v2005_v0  ;;  %s1623_s22 = sshll.u32 %s2020_s20, 4  ;;  %s1624_s22 = int_to_ptr.vmem [resolvable:$true] %s1623_s22 }
  0x3f   :  { %s1972_s23 = scalar_lea.vmem %s1624_s22, 256  ;;  %p1977_p11 = scmp.lt.s32.totalorder %s1624_s22, %s1624_s22 }
  0x40   :  { %p1973_p10 = scmp.ne.s32.totalorder %s1624_s22, %s1972_s23  ;;  %p1978_p12 = scmp.lt.s32.totalorder %s1972_s23, %s1972_s23 }
  0x41   :  { %1723 = vmatpush3.bf16.msra.mxu0 %v1865_v3 }
  0x42   :  { %1724 = vmatprep.subr.bf16.mxu0 %v2005_v0  ;;  %p1979_p13 = por %p1978_p12, %p1977_p11 }
  0x44   :  { %p1980_p0 = pnand %p1979_p13, %p1973_p10 }
  0x45   :  { %1725 = vmatpush3.bf16.msra.mxu0 %v1866_v4 }
  0x46   :  { %1726 = vmatprep.subr.bf16.mxu0 %v2005_v0 }
  0x49   :  { %1727 = vmatpush3.bf16.msra.mxu0 %v1867_v5 }
  0x4a   :  { %1728 = vmatprep.subr.bf16.mxu0 %v2005_v0 }
  0x4d   :  { %1729 = vmatpush3.bf16.msra.mxu0 %v1868_v6 }
  0x4e   :  { %1730 = vmatprep.subr.bf16.mxu0 %v2005_v0 }
  0x51   :  { %1731 = vmatpush3.bf16.msra.mxu0 %v1869_v7 }
  0x52   :  { %1732 = vmatprep.subr.bf16.mxu0 %v2005_v0 }
  0x55   :  { %1733 = vmatpush3.bf16.msra.mxu0 %v1870_v8 }
  0x56   :  { %1738 = vmatprep.subr.mxu0 %v2005_v0 }
  0x58   :  { %1735 = vmatmul.mubr.bf16.vlgmr.msra.gmra.mrb[0].mxu0 %v1871_v9 }
  0x59   :  { %1740 = vmatprep.mubr.msk.f32.mxu0 %vm2006_vm0, %v2005_v0 }
 0x12b   :  { %v176_v11 = vpop.f32.mrb[0].mxu0 }
 0x12c   :  { %v2123_v12 = vadd.f32 %v1636_v10, %v176_v11  ;;  %v1736_v13 = vpop.f32.mrb[1].mxu0 }
 0x12d   :  { %v179_v14 = vpop.f32.mrb[2].mxu0 }
 0x12e   :  { %v2125_v15 = vadd.f32 %v1636_v10, %v179_v14  ;;  %v1737_v16 = vpop.f32.mrb[3].mxu0  ;;  %274 = vrot.lane.b32.xlu1 %v2123_v12, %s2002_s30  ;;  %184 = vrot.lane.b32.xlu0 %v2123_v12, %s2007_s6 }
 0x132   :  { %352 = vrot.lane.b32.xlu1 %v2123_v12, %s2008_s7 }
 0x1a0   :  { %v275_v17 = vpop.permute.xlu1 %274  ;;  %v185_v18 = vpop.permute.xlu0 %184 }
 0x1a1   :  { %1739 = vmatpush3.xpose.msk.msra.mxu0 %vm186_vm1, %v185_v18  ;;  %1744 = vmatpush3.msra.mxu1 %v275_v17 }
 0x1a2   :  { %1748 = vmatprep.subr.mxu1 %v2005_v0  ;;  %1783 = vmatprep.subr.mxu0 %v2005_v0 }
 0x1a4   :  { %1741 = vmatmul.mubr.msk.f32.vlgmr.msra.gmra.mrb[4].mxu0 %vm186_vm1, %v2123_v12  ;;  %v353_v30 = vpop.permute.xlu1 %352 }
 0x1a5   :  { %1785 = vmatprep.mubr.msk.f32.mxu0 %vm2006_vm0, %v2005_v0 }
 0x277   :  { %v257_v19 = vpop.f32.mrb[4].mxu0 }
 0x278   :  { %v261_v21 = vmul.f32 0.35355338, %v257_v19  ;;  %v1742_v22 = vpop.f32.mrb[5].mxu0 }
 0x27a   :  { %v262_v23 = vadd.f32 %v261_v21, %v2143_v20 }
 0x27c   :  { %v263_v24 = vsel %vm186_vm1, %v262_v23, -inf }
 0x27d   :  { %264 = vmax.xlane.f32.xlu0 %v263_v24 }
 0x293   :  { %441 = vrot.lane.b32.xlu0 %v2123_v12, %s2009_s10 }
 0x297   :  { %519 = vrot.lane.b32.xlu0 %v2123_v12, %s2010_s11 }
 0x30a   :  { %v265_v25 = vpop.xlane.xlu0 %264 }
 0x30b   :  { %v266_v26 = vsub.f32 %v262_v23, %v265_v25 }
 0x30d   :  { %v267_v27 = vmul.f32 1.442695, %v266_v26 }
 0x30e   :  { %v442_v35 = vpop.permute.xlu0 %441 }
 0x30f   :  { %1874 = vpow2.f32 %v267_v27 }
 0x312   :  { %v520_v48 = vpop.permute.xlu0 %519 }
 0x319   :  { %v1875_v28 = vpop.eup %1874 }
 0x31a   :  { %v269_v29 = vsel %vm186_vm1, %v1875_v28, 0.0 }
 0x31b   :  { %270 = vadd.xlane.f32.xlu1 %v269_v29 }
 0x32c   :  { %350 = vrot.lane.b32.xlu1 %v2123_v12, %s2011_s4 }
 0x3a8   :  { %v271_v31 = vpop.xlane.xlu1 %270 }
 0x3a9   :  { %1876 = vrcp.f32 %v271_v31 }
 0x3ac   :  { %v351_v34 = vpop.permute.xlu1 %350 }
 0x3b3   :  { %v1877_v32 = vpop.eup %1876 }
 0x3b4   :  { %v273_v33 = vmul.f32 %v1877_v32, %v1875_v28 }
 0x3b6   :  { %1746 = vmatmul.mubr.msk.f32.vlgmr.msra.gmra.mrb[0].mxu1 %vm186_vm1, %v273_v33 }
 0x3b7   :  { %1749 = vmatpush3.xpose.msk.msra.mxu1 %vm186_vm1, %v353_v30  ;;  %1750 = vmatprep.mubr.msk.f32.mxu1 %vm2006_vm0, %v2005_v0 }
 0x3b8   :  { %1753 = vmatprep.subr.mxu1 %v2005_v0 }
 0x3ba   :  { %1751 = vmatmul.mubr.msk.f32.vlgmr.msra.gmra.mrb[2].mxu1 %vm186_vm1, %v351_v34 }
 0x3bb   :  { %1754 = vmatpush3.msra.mxu1 %v442_v35  ;;  %1755 = vmatprep.mubr.msk.f32.mxu1 %vm2006_vm0, %v2005_v0 }
 0x3bc   :  { %1758 = vmatprep.subr.mxu1 %v2005_v0 }
 0x489   :  { %v2163_v36 = vpop.f32.mrb[0].mxu1 }
 0x48a   :  { %v1747_v37 = vpop.f32.mrb[1].mxu1 }
 0x48d   :  { %v424_v38 = vpop.f32.mrb[2].mxu1 }
 0x48e   :  { %v428_v39 = vmul.f32 0.35355338, %v424_v38  ;;  %v1752_v40 = vpop.f32.mrb[3].mxu1 }
 0x490   :  { %v429_v41 = vadd.f32 %v428_v39, %v2143_v20 }
 0x492   :  { %v430_v42 = vsel %vm186_vm1, %v429_v41, -inf }
 0x493   :  { %431 = vmax.xlane.f32.xlu1 %v430_v42 }
 0x520   :  { %v432_v43 = vpop.xlane.xlu1 %431 }
 0x521   :  { %v433_v44 = vsub.f32 %v429_v41, %v432_v43 }
 0x523   :  { %v434_v45 = vmul.f32 1.442695, %v433_v44 }
 0x525   :  { %1878 = vpow2.f32 %v434_v45 }
 0x52f   :  { %v1879_v46 = vpop.eup %1878 }
 0x530   :  { %v436_v47 = vsel %vm186_vm1, %v1879_v46, 0.0 }
 0x531   :  { %437 = vadd.xlane.f32.xlu0 %v436_v47 }
 0x547   :  { %517 = vrot.lane.b32.xlu0 %v2123_v12, %s2012_s12 }
 0x5be   :  { %v438_v49 = vpop.xlane.xlu0 %437 }
 0x5bf   :  { %1880 = vrcp.f32 %v438_v49 }
 0x5c2   :  { %v518_v52 = vpop.permute.xlu0 %517 }
 0x5c9   :  { %v1881_v50 = vpop.eup %1880 }
 0x5ca   :  { %v440_v51 = vmul.f32 %v1881_v50, %v1879_v46 }
 0x5cc   :  { %1756 = vmatmul.mubr.msk.f32.vlgmr.msra.gmra.mrb[4].mxu1 %vm186_vm1, %v440_v51 }
 0x5cd   :  { %1759 = vmatpush3.xpose.msk.msra.mxu1 %vm186_vm1, %v520_v48  ;;  %1760 = vmatprep.mubr.msk.f32.mxu1 %vm2006_vm0, %v2005_v0 }
 0x5ce   :  { %1763 = vmatprep.subr.mxu1 %v2005_v0 }
 0x5d0   :  { %1761 = vmatmul.mubr.msk.f32.vlgmr.msra.gmra.mrb[6].mxu1 %vm186_vm1, %v518_v52 }
 0x5d1   :  { %1765 = vmatprep.mubr.msk.f32.mxu1 %vm2006_vm0, %v2005_v0 }
 0x69f   :  { %v2178_v53 = vpop.f32.mrb[4].mxu1 }
 0x6a0   :  { %v1757_v54 = vpop.f32.mrb[5].mxu1 }
 0x6a3   :  { %v591_v55 = vpop.f32.mrb[6].mxu1 }
 0x6a4   :  { %v595_v56 = vmul.f32 0.35355338, %v591_v55  ;;  %v1762_v57 = vpop.f32.mrb[7].mxu1 }
 0x6a6   :  { %v596_v58 = vadd.f32 %v595_v56, %v2143_v20 }
 0x6a8   :  { %v597_v59 = vsel %vm186_vm1, %v596_v58, -inf }
 0x6a9   :  { %598 = vmax.xlane.f32.xlu1 %v597_v59 }
 0x6ba   :  { %608 = vrot.lane.b32.xlu1 %v2123_v12, %s2013_s13 }
 0x6be   :  { %686 = vrot.lane.b32.xlu1 %v2123_v12, %s2014_s14 }
 0x6c2   :  { %684 = vrot.lane.b32.xlu1 %v2123_v12, %s2015_s15 }
 0x736   :  { %v599_v60 = vpop.xlane.xlu1 %598 }
 0x737   :  { %v600_v61 = vsub.f32 %v596_v58, %v599_v60 }
 0x739   :  { %v601_v62 = vmul.f32 1.442695, %v600_v61 }
 0x73a   :  { %v609_v63 = vpop.permute.xlu1 %608 }
 0x73b   :  { %1882 = vpow2.f32 %v601_v62  ;;  %1764 = vmatpush3.msra.mxu1 %v609_v63 }
 0x73c   :  { %1768 = vmatprep.subr.mxu1 %v2005_v0 }
 0x73e   :  { %v687_v5 = vpop.permute.xlu1 %686 }
 0x742   :  { %v685_v7 = vpop.permute.xlu1 %684 }
 0x745   :  { %v1883_v1 = vpop.eup %1882 }
 0x746   :  { %v603_v2 = vsel %vm186_vm1, %v1883_v1, 0.0 }
 0x747   :  { %604 = vadd.xlane.f32.xlu0 %v603_v2 }
 0x75d   :  { %775 = vrot.lane.b32.xlu0 %v2123_v12, %s2016_s16 }
 0x761   :  { %869 = vrot.lane.b32.xlu0 %v2125_v15, %s2007_s6 }
 0x765   :  { %1036 = vrot.lane.b32.xlu0 %v2125_v15, %s2008_s7 }
 0x7d4   :  { %v605_v3 = vpop.xlane.xlu0 %604 }
 0x7d5   :  { %1884 = vrcp.f32 %v605_v3 }
 0x7d8   :  { %v776_v8 = vpop.permute.xlu0 %775 }
 0x7dc   :  { %v870_v23 = vpop.permute.xlu0 %869 }
 0x7df   :  { %v1885_v4 = vpop.eup %1884 }
 0x7e0   :  { %v607_v6 = vmul.f32 %v1885_v4, %v1883_v1  ;;  %v1037_v24 = vpop.permute.xlu0 %1036 }
 0x7e2   :  { %1766 = vmatmul.mubr.msk.f32.vlgmr.msra.gmra.mrb[8].mxu1 %vm186_vm1, %v607_v6 }
 0x7e3   :  { %1769 = vmatpush3.xpose.msk.msra.mxu1 %vm186_vm1, %v687_v5  ;;  %1770 = vmatprep.mubr.msk.f32.mxu1 %vm2006_vm0, %v2005_v0 }
 0x7e4   :  { %1773 = vmatprep.subr.mxu1 %v2005_v0 }
 0x7e6   :  { %1771 = vmatmul.mubr.msk.f32.vlgmr.msra.gmra.mrb[10].mxu1 %vm186_vm1, %v685_v7 }
 0x7e7   :  { %1774 = vmatpush3.msra.mxu1 %v776_v8  ;;  %1775 = vmatprep.mubr.msk.f32.mxu1 %vm2006_vm0, %v2005_v0 }
 0x7e8   :  { %1778 = vmatprep.subr.mxu1 %v2005_v0 }
 0x8b5   :  { %v2205_v9 = vpop.f32.mrb[8].mxu1 }
 0x8b6   :  { %v1767_v10 = vpop.f32.mrb[9].mxu1 }
 0x8b9   :  { %v758_v11 = vpop.f32.mrb[10].mxu1 }
 0x8ba   :  { %v762_v12 = vmul.f32 0.35355338, %v758_v11  ;;  %v1772_v13 = vpop.f32.mrb[11].mxu1 }
 0x8bc   :  { %v763_v14 = vadd.f32 %v762_v12, %v2143_v20 }
 0x8be   :  { %v764_v16 = vsel %vm186_vm1, %v763_v14, -inf }
 0x8bf   :  { %765 = vmax.xlane.f32.xlu1 %v764_v16 }
 0x8d0   :  { %1034 = vrot.lane.b32.xlu1 %v2125_v15, %s2011_s4 }
 0x94c   :  { %v766_v17 = vpop.xlane.xlu1 %765 }
 0x94d   :  { %v767_v18 = vsub.f32 %v763_v14, %v766_v17 }
 0x94f   :  { %v768_v19 = vmul.f32 1.442695, %v767_v18 }
 0x950   :  { %v1035_v30 = vpop.permute.xlu1 %1034 }
 0x951   :  { %1886 = vpow2.f32 %v768_v19 }
 0x95b   :  { %v1887_v21 = vpop.eup %1886 }
 0x95c   :  { %v770_v22 = vsel %vm186_vm1, %v1887_v21, 0.0 }
 0x95d   :  { %771 = vadd.xlane.f32.xlu0 %v770_v22 }
 0x973   :  { %1203 = vrot.lane.b32.xlu0 %v2125_v15, %s2010_s11 }
 0x977   :  { %1201 = vrot.lane.b32.xlu0 %v2125_v15, %s2012_s12 }
 0x97b   :  { %1370 = vrot.lane.b32.xlu0 %v2125_v15, %s2014_s14 }
 0x97f   :  { %1368 = vrot.lane.b32.xlu0 %v2125_v15, %s2015_s15 }
 0x9ea   :  { %v772_v25 = vpop.xlane.xlu0 %771 }
 0x9eb   :  { %1888 = vrcp.f32 %v772_v25 }
 0x9ee   :  { %v1204_v27 = vpop.permute.xlu0 %1203 }
 0x9f2   :  { %v1202_v29 = vpop.permute.xlu0 %1201 }
 0x9f5   :  { %v1889_v26 = vpop.eup %1888 }
 0x9f6   :  { %v774_v28 = vmul.f32 %v1889_v26, %v1887_v21  ;;  %v1371_v31 = vpop.permute.xlu0 %1370 }
 0x9f8   :  { %1776 = vmatmul.mubr.msk.f32.vlgmr.msra.gmra.mrb[12].mxu1 %vm186_vm1, %v774_v28 }
 0x9f9   :  { %1779 = vmatpush3.xpose.msk.msra.mxu1 %vm186_vm1, %v870_v23  ;;  %1780 = vmatprep.mubr.msk.f32.mxu1 %vm2006_vm0, %v2005_v0 }
 0x9fa   :  { %1788 = vmatprep.subr.mxu1 %v2005_v0  ;;  %v1369_v32 = vpop.permute.xlu0 %1368 }
 0x9fc   :  { %1781 = vmatmul.mubr.msk.f32.vlgmr.msra.gmra.mrb[14].mxu1 %vm186_vm1, %v2125_v15 }
 0x9fd   :  { %1789 = vmatpush3.xpose.msk.msra.mxu1 %vm186_vm1, %v1037_v24  ;;  %1790 = vmatprep.mubr.msk.f32.mxu1 %vm2006_vm0, %v2005_v0 }
 0x9fe   :  { %1798 = vmatprep.subr.mxu1 %v2005_v0 }
 0xa00   :  { %1791 = vmatmul.mubr.msk.f32.vlgmr.msra.gmra.mrb[16].mxu1 %vm186_vm1, %v1035_v30 }
 0xa01   :  { %1799 = vmatpush3.xpose.msk.msra.mxu1 %vm186_vm1, %v1204_v27  ;;  %1800 = vmatprep.mubr.msk.f32.mxu1 %vm2006_vm0, %v2005_v0 }
 0xa02   :  { %1808 = vmatprep.subr.mxu1 %v2005_v0 }
 0xa04   :  { %1801 = vmatmul.mubr.msk.f32.vlgmr.msra.gmra.mrb[18].mxu1 %vm186_vm1, %v1202_v29 }
 0xa05   :  { %1809 = vmatpush3.xpose.msk.msra.mxu1 %vm186_vm1, %v1371_v31  ;;  %1810 = vmatprep.mubr.msk.f32.mxu1 %vm2006_vm0, %v2005_v0 }
 0xa06   :  { %1818 = vmatprep.subr.bf16.mxu1 %v2005_v0 }
 0xa08   :  { %1811 = vmatmul.mubr.msk.f32.vlgmr.msra.gmra.mrb[20].mxu1 %vm186_vm1, %v1369_v32 }
 0xa09   :  { %1822 = vmatprep.mubr.msk.bf16.mxu1 %vm2006_vm0, %v2005_v0 }
 0xacb   :  { %v2244_v33 = vpop.f32.mrb[12].mxu1 }
 0xacc   :  { %v1777_v34 = vpop.f32.mrb[13].mxu1 }
 0xacf   :  { %v941_v35 = vpop.f32.mrb[14].mxu1 }
 0xad0   :  { %v945_v37 = vmul.f32 0.35355338, %v941_v35  ;;  %v1782_v38 = vpop.f32.mrb[15].mxu1 }
 0xad1   :  { %v1872_v38 = vld [vmem:[#allocation7] sm:$0xff]  }
 0xad2   :  { %v946_v39 = vadd.f32 %v945_v37, %v2143_v20  ;;  %1819 = vmatpush3.bf16.msra.mxu1 %v1872_v38 }
 0xad3   :  { %v1108_v40 = vpop.f32.mrb[16].mxu1  ;;  %1820 = vmatprep.subr.bf16.mxu1 %v2005_v0 }
 0xad4   :  { %v1112_v41 = vmul.f32 0.35355338, %v1108_v40  ;;  %v1792_v42 = vpop.f32.mrb[17].mxu1  ;;  %v947_v43 = vsel %vm186_vm1, %v946_v39, -inf }
 0xad5   :  { %948 = vmax.xlane.f32.xlu1 %v947_v43 }
 0xad6   :  { %v1113_v44 = vadd.f32 %v1112_v41, %v2143_v20 }
 0xad7   :  { %v1275_v45 = vpop.f32.mrb[18].mxu1 }
 0xad8   :  { %v1279_v46 = vmul.f32 0.35355338, %v1275_v45  ;;  %v1802_v47 = vpop.f32.mrb[19].mxu1  ;;  %v1114_v48 = vsel %vm186_vm1, %v1113_v44, -inf }
 0xad9   :  { %1115 = vmax.xlane.f32.xlu0 %v1114_v48 }
 0xada   :  { %v1280_v49 = vadd.f32 %v1279_v46, %v2143_v20 }
 0xadb   :  { %v1442_v50 = vpop.f32.mrb[20].mxu1 }
 0xadc   :  { %v1446_v51 = vmul.f32 0.35355338, %v1442_v50  ;;  %v1812_v52 = vpop.f32.mrb[21].mxu1  ;;  %v1281_v54 = vsel %vm186_vm1, %v1280_v49, -inf }
 0xadd   :  { %1282 = vmax.xlane.f32.xlu0 %v1281_v54 }
 0xade   :  { %v1447_v55 = vadd.f32 %v1446_v51, %v2143_v20 }
 0xae0   :  { %v1448_v56 = vsel %vm186_vm1, %v1447_v55, -inf }
 0xae1   :  { %1449 = vmax.xlane.f32.xlu1 %v1448_v56 }
 0xaf2   :  { %1125 = vrot.lane.b32.xlu1 %v2125_v15, %s2009_s10 }
 0xb62   :  { %v949_v57 = vpop.xlane.xlu1 %948 }
 0xb63   :  { %v950_v58 = vsub.f32 %v946_v39, %v949_v57  ;;  %v1873_v39 = vld [vmem:[#allocation7 + $0x8] sm:$0xff]  }
 0xb64   :  { %1821 = vmatpush3.bf16.msra.mxu1 %v1873_v39 }
 0xb65   :  { %v951_v59 = vmul.f32 1.442695, %v950_v58 }
 0xb66   :  { %v1116_v60 = vpop.xlane.xlu0 %1115 }
 0xb67   :  { %1890 = vpow2.f32 %v951_v59  ;;  %v1117_v61 = vsub.f32 %v1113_v44, %v1116_v60  ;;  %v1670_v59 = vld [vmem:[%s2306_s3 + $0x1] ss:$0 sm:$0xff] }
 0xb69   :  { %v1118_v62 = vmul.f32 1.442695, %v1117_v61 }
 0xb6a   :  { %v1283_v8 = vpop.xlane.xlu0 %1282 }
 0xb6b   :  { %1892 = vpow2.f32 %v1118_v62  ;;  %v1284_v10 = vsub.f32 %v1280_v49, %v1283_v8 }
 0xb6d   :  { %v1285_v11 = vmul.f32 1.442695, %v1284_v10 }
 0xb6e   :  { %v1450_v63 = vpop.xlane.xlu1 %1449 }
 0xb6f   :  { %v1451_v1 = vsub.f32 %v1447_v55, %v1450_v63 }
 0xb71   :  { %v1891_v2 = vpop.eup %1890  ;;  %v1452_v3 = vmul.f32 1.442695, %v1451_v1 }
 0xb72   :  { %v953_v20 = vsel %vm186_vm1, %v1891_v2, 0.0  ;;  %v1126_v14 = vpop.permute.xlu1 %1125 }
 0xb73   :  { %1894 = vpow2.f32 %v1452_v3  ;;  %954 = vadd.xlane.f32.xlu0 %v953_v20 }
 0xb74   :  { %1896 = vpow2.f32 %v1285_v11 }
 0xb75   :  { %v1893_v4 = vpop.eup %1892 }
 0xb76   :  { %v1120_v5 = vsel %vm186_vm1, %v1893_v4, 0.0 }
 0xb77   :  { %1121 = vadd.xlane.f32.xlu1 %v1120_v5 }
 0xb7d   :  { %v1895_v6 = vpop.eup %1894 }
 0xb7e   :  { %v1454_v7 = vsel %vm186_vm1, %v1895_v6, 0.0  ;;  %v1897_v12 = vpop.eup %1896 }
 0xb7f   :  { %1455 = vadd.xlane.f32.xlu1 %v1454_v7  ;;  %v1287_v13 = vsel %vm186_vm1, %v1897_v12, 0.0 }
 0xb89   :  { %958 = vrot.lane.b32.xlu0 %v2125_v15, %s2002_s30  ;;  %s2017_s30 = smov 8  }
 0xb90   :  { %1292 = vrot.lane.b32.xlu1 %v2125_v15, %s2013_s13 }
 0xba8   :  { %1288 = vadd.xlane.f32.xlu0 %v1287_v13 }
 0xbbe   :  { %1459 = vrot.lane.b32.xlu0 %v2125_v15, %s2016_s16 }
 0xc00   :  { %v955_v16 = vpop.xlane.xlu0 %954 }
 0xc01   :  { %1898 = vrcp.f32 %v955_v16 }
 0xc04   :  { %v959_v17 = vpop.permute.xlu0 %958  ;;  %v1122_v18 = vpop.xlane.xlu1 %1121 }
 0xc05   :  { %1900 = vrcp.f32 %v1122_v18  ;;  %1784 = vmatpush3.msra.mxu0 %v959_v17 }
 0xc06   :  { %1793 = vmatprep.subr.mxu0 %v2005_v0 }
 0xc0b   :  { %v1899_v19 = vpop.eup %1898 }
 0xc0c   :  { %v957_v21 = vmul.f32 %v1899_v19, %v1891_v2  ;;  %v1456_v22 = vpop.xlane.xlu1 %1455 }
 0xc0e   :  { %1786 = vmatmul.mubr.msk.f32.vlgmr.msra.gmra.mrb[6].mxu0 %vm186_vm1, %v957_v21 }
 0xc0f   :  { %v1901_v23 = vpop.eup %1900  ;;  %1794 = vmatpush3.msra.mxu0 %v1126_v14  ;;  %1795 = vmatprep.mubr.msk.f32.mxu0 %vm2006_vm0, %v2005_v0 }
 0xc10   :  { %v1124_v15 = vmul.f32 %v1901_v23, %v1893_v4  ;;  %v1293_v24 = vpop.permute.xlu1 %1292  ;;  %1803 = vmatprep.subr.mxu0 %v2005_v0 }
 0xc12   :  { %1796 = vmatmul.mubr.msk.f32.vlgmr.msra.gmra.mrb[8].mxu0 %vm186_vm1, %v1124_v15 }
 0xc13   :  { %1804 = vmatpush3.msra.mxu0 %v1293_v24  ;;  %1805 = vmatprep.mubr.msk.f32.mxu0 %vm2006_vm0, %v2005_v0 }
 0xc14   :  { %1813 = vmatprep.subr.mxu0 %v2005_v0 }
 0xc35   :  { %v1289_v25 = vpop.xlane.xlu0 %1288 }
 0xc36   :  { %1902 = vrcp.f32 %v1289_v25 }
 0xc37   :  { %1904 = vrcp.f32 %v1456_v22 }
 0xc39   :  { %v1460_v29 = vpop.permute.xlu0 %1459 }
 0xc40   :  { %v1903_v26 = vpop.eup %1902 }
 0xc41   :  { %v1291_v27 = vmul.f32 %v1903_v26, %v1897_v12  ;;  %v1905_v28 = vpop.eup %1904 }
 0xc42   :  { %v1458_v30 = vmul.f32 %v1905_v28, %v1895_v6 }
 0xc43   :  { %1806 = vmatmul.mubr.msk.f32.vlgmr.msra.gmra.mrb[10].mxu0 %vm186_vm1, %v1291_v27 }
 0xc44   :  { %1814 = vmatpush3.msra.mxu0 %v1460_v29  ;;  %1815 = vmatprep.mubr.msk.f32.mxu0 %vm2006_vm0, %v2005_v0 }
 0xc47   :  { %1816 = vmatmul.mubr.msk.f32.vlgmr.msra.gmra.mrb[12].mxu0 %vm186_vm1, %v1458_v30 }
 0xce1   :  { %v1030_v31 = vpop.f32.mrb[6].mxu0 }
 0xce2   :  { %v1787_v32 = vpop.f32.mrb[7].mxu0 }
 0xce5   :  { %v1197_v34 = vpop.f32.mrb[8].mxu0 }
 0xce6   :  { %v1848_v35 = vpack.i.bf16 %v1197_v34, %v2178_v53  ;;  %v1797_v37 = vpop.f32.mrb[9].mxu0 }
 0xce8   :  { %1849 = vrot.lane.b32.xlu1 %v1848_v35, %s2017_s30 }
 0xd16   :  { %v1364_v40 = vpop.f32.mrb[10].mxu0 }
 0xd17   :  { %v1853_v41 = vpack.i.bf16 %v1364_v40, %v2205_v9  ;;  %v1807_v42 = vpop.f32.mrb[11].mxu0 }
 0xd19   :  { %1854 = vrot.lane.b32.xlu0 %v1853_v41, %s2018_s1 }
 0xd1a   :  { %v1531_v43 = vpop.f32.mrb[12].mxu0 }
 0xd1b   :  { %v1858_v44 = vpack.i.bf16 %v1531_v43, %v2244_v33  ;;  %v1817_v53 = vpop.f32.mrb[13].mxu0 }
 0xd1d   :  { %1859 = vrot.lane.b32.xlu1 %v1858_v44, %s2019_s17 }
 0xd5a   :  { %v1850_v45 = vpop.permute.xlu1 %1849 }
 0xd5b   :  { %v1852_v47 = vunpack.i.h.bf16 %v1850_v45  ;;  %v1851_v48 = vunpack.i.l.bf16 %v1850_v45 }
 0xd5d   :  { %v1547_v9 = vsel %vm186_vm1, %v1030_v31, %v1852_v47  ;;  %v863_v51 = vsel %vm186_vm1, %v2163_v36, %v1851_v48 }
 0xd8b   :  { %v1855_v46 = vpop.permute.xlu0 %1854 }
 0xd8c   :  { %v1857_v49 = vunpack.i.h.bf16 %v1855_v46  ;;  %v1856_v0 = vunpack.i.l.bf16 %v1855_v46 }
 0xd8e   :  { %v1548_v33 = vsel %vm864_vm2, %v1547_v9, %v1857_v49  ;;  %v865_v55 = vsel %vm864_vm2, %v863_v51, %v1856_v0 }
 0xd8f   :  { %v1860_v50 = vpop.permute.xlu1 %1859 }
 0xd90   :  { %v1862_v52 = vunpack.i.h.bf16 %v1860_v50  ;;  %v1861_v54 = vunpack.i.l.bf16 %v1860_v50 }
 0xd92   :  { %v1549_v56 = vsel %vm866_vm3, %v1548_v33, %v1862_v52  ;;  %v867_v57 = vsel %vm866_vm3, %v865_v55, %v1861_v54 }
 0xd93   :  { %v1550_v58 = vpack.c.bf16 %v1549_v56, %v867_v57 }
 0xd95   :  { %1823 = vmatmul.mubr.msk.bf16.vlgmr.msra.gmra.mrb[24].mxu1 %vm1571_vm4, %v1550_v58 }
 0xe68   :  { %v1609_v60 = vpop.f32.mrb[24].mxu1 }
 0xe69   :  { %v1610_v61 = vadd.f32 %v1670_v59, %v1609_v60  ;;  %v1824_v62 = vpop.f32.mrb[25].mxu1 }
 0xe6a   :  { %v1612_v63 = vpop.f32.mrb[26].mxu1 }
 0xe6b   :  { %1616 = vst [vmem:[#allocation8] sm:$0xff] %v1610_v61  ;;  %v1613_v36 = vadd.f32 %v1670_v59, %v1612_v63  ;;  %v1825_v1 = vpop.f32.mrb[27].mxu1 }
 0xe6d   :  { %1617 = vst [vmem:[#allocation8 + $0x8] sm:$0xff] %v1613_v36 }
 0xe6e   :  { %1983 = shalt.err (!%p1980_p0)
}
 0xe6f   :  { %s1984_s25 = scalar_lea.hbm %s2308_s5, 256 }
 0xe70   :  { %p1985_p1 = scmp.ne.s32.totalorder %s2308_s5, %s1984_s25  ;;  %p1988_p2 = scmp.lt.u32.totalorder %s1984_s25, %s2308_s5 }
 0xe72   :  { %p1990_p3 = pnand %p1988_p2, %p1985_p1 }
 0xe74   :  { %1993 = shalt.err (!%p1990_p3)
}
 0xe75   :  { %s2021_s21 = smov 128  }
 0xe76   :  { %1629 = dma.vmem_to_hbm [thread:$0]  %s1624_s22, 256, %s2308_s5, [#allocation4], %s2021_s21, %s2021_s21, %s2017_s30  }
 0xe77   :  { %1998 = dma.done.wait [#allocation4], 256  }
 0xe78   :  { %1999 = vsyncadd [#allocation4], 4294967040 }
 0xe79   :  { %1633 = vsyncpa [#allocation3], 1 }
 0xe7a   :  { %1634 = vsyncpa [#allocation6], 1 }
 0xe7b   :  { %1635 = vsyncpa [#allocation4], 1 }

</bundles_post_ra>
